<compile_context>
chip_gen: v5e
topology: v5e:2x2
jax: 0.10.0
libtpu: 0.0.40
codegen_flags: <defaults>
</compile_context>

<pallas_src>
import functools

import jax
import jax.numpy as jnp
from jax.experimental import pallas as pl
from jax.experimental.pallas import tpu as pltpu


# ----------------------------- small helpers --------------------------------
def _pair(v):
    return (v, v) if isinstance(v, int) else tuple(v)


def _quadruple(v):
    return (v,) * 4 if isinstance(v, int) else tuple(v)


def _same_padding(h, w, k, s):
    ph = max(k[0] - s[0], 0) if h % s[0] == 0 else max(k[0] - h % s[0], 0)
    pw = max(k[1] - s[1], 0) if w % s[1] == 0 else max(k[1] - w % s[1], 0)
    return pw // 2, pw - pw // 2, ph // 2, ph - ph // 2


# ----------------------------- median networks ------------------------------
def _sort2(p, i, j):
    a, b = p[i], p[j]
    p[i] = jnp.minimum(a, b)
    p[j] = jnp.maximum(a, b)


def _median_of_9(v):
    """Devillard/Smith 19-exchange median-of-9 network, unused halves dropped.

    30 element-wise min/max ops total (vs. 72 for a full odd-even sort).
    """
    mn, mx = jnp.minimum, jnp.maximum
    p = list(v)
    _sort2(p, 1, 2); _sort2(p, 4, 5); _sort2(p, 7, 8)
    _sort2(p, 0, 1); _sort2(p, 3, 4); _sort2(p, 6, 7)
    _sort2(p, 1, 2); _sort2(p, 4, 5); _sort2(p, 7, 8)
    p[3] = mx(p[0], p[3])          # sort2(0,3): only the max is consumed later
    p[5] = mn(p[5], p[8])          # sort2(5,8): only the min
    _sort2(p, 4, 7)                # sort2(4,7): both halves needed
    p[6] = mx(p[3], p[6])          # sort2(3,6): only the max
    p[4] = mx(p[1], p[4])          # sort2(1,4): only the max
    p[2] = mn(p[2], p[5])          # sort2(2,5): only the min
    p[4] = mn(p[4], p[7])          # sort2(4,7): only the min
    _sort2(p, 4, 2)                # sort2(4,2): both halves needed
    p[4] = mx(p[6], p[4])          # sort2(6,4): only the max
    return mn(p[4], p[2])          # sort2(4,2): the median is the min


def _lower_median(vals):
    """Element-wise lower median (rank (n-1)//2) of a list of arrays."""
    n = len(vals)
    if n == 1:
        return vals[0]
    if n == 9:
        return _median_of_9(vals)
    # Generic fallback for non-3x3 kernels: odd-even transposition sort network.
    v = list(vals)
    for rnd in range(n):
        for i in range(rnd % 2, n - 1, 2):
            _sort2(v, i, i + 1)
    return v[(n - 1) // 2]


# ------------------------------- the kernel ---------------------------------
def _median_pool_kernel(*refs, k, stride, use_halo, compute_dtype):
    k0, k1 = k
    s0, s1 = stride
    if use_halo:
        x_ref, halo_ref, o_ref = refs
        # main tile rows + (k0-1) halo rows -> (TH + k0 - 1, W_pad, C_blk)
        x = jnp.concatenate([x_ref[...], halo_ref[...]], axis=0)
    else:
        x_ref, o_ref = refs
        x = x_ref[...]
    x = x.astype(compute_dtype)

    th_out, w_out = o_ref.shape[0], o_ref.shape[1]
    h_span = (th_out - 1) * s0 + 1
    w_span = (w_out - 1) * s1 + 1

    # Gather the k0*k1 shifted window views. H is the (untiled) major dim and
    # W is the sublane dim; the lane dim (channels) is never shifted or strided.
    vals = []
    for di in range(k0):
        for dj in range(k1):
            h_sl = slice(di, di + h_span) if s0 == 1 else slice(di, di + h_span, s0)
            w_sl = slice(dj, dj + w_span) if s1 == 1 else slice(dj, dj + w_span, s1)
            vals.append(x[h_sl, w_sl, :])

    o_ref[...] = _lower_median(vals).astype(o_ref.dtype)


# ------------------------------- the wrapper --------------------------------
def _pick_row_tile(h_out, row_bytes, k0):
    """Pick an output-row tile height TH with: TH | h_out, (k0-1) | TH.

    Prefers >= 2 tiles (megacore) and keeps one input tile around <= 512 KiB
    so the tile + ~10 candidate temporaries + double-buffered DMA stay well
    inside the v7x VMEM budget. Returns None if no valid TH exists.
    """
    if k0 < 2 or h_out < 1:
        return None
    step = k0 - 1
    divisors = [d for d in range(step, h_out + 1, step) if h_out % d == 0]
    if not divisors:
        return None
    cap = max(step, (512 * 1024) // max(row_bytes, 1))
    proper = [d for d in divisors if d <= cap and d < h_out]
    if proper:
        return max(proper)
    small = [d for d in divisors if d <= cap]
    if small:
        return max(small)
    return min(divisors)


def median_pool2d(x, kernel_size=3, stride=1, padding=0, same=True):
    k = _pair(kernel_size)
    s = _pair(stride)
    N, C, H, W = x.shape
    if same:
        p_l, p_r, p_t, p_b = _same_padding(H, W, k, s)
    else:
        p_l, p_r, p_t, p_b = _quadruple(padding)

    nc = N * C
    # Channels-last so the fused (N*C) axis is the lane (last) dimension.
    x_cl = jnp.transpose(x.reshape(nc, H, W), (1, 2, 0))          # (H, W, NC)
    x_pad = jnp.pad(x_cl, ((p_t, p_b), (p_l, p_r), (0, 0)), mode="reflect")

    H_pad, W_pad = H + p_t + p_b, W + p_l + p_r
    h_out = (H_pad - k[0]) // s[0] + 1
    w_out = (W_pad - k[1]) // s[1] + 1

    # Compute dtype: keep 32-bit math in the min/max network (exact selection).
    if jnp.issubdtype(x.dtype, jnp.floating):
        compute_dtype = jnp.float32 if jnp.dtype(x.dtype).itemsize < 4 else x.dtype
    else:
        compute_dtype = jnp.int32 if jnp.dtype(x.dtype).itemsize < 4 else x.dtype

    # Channel (lane) tiling: 128-wide lane-dense tiles when possible.
    c_blk = 128 if nc % 128 == 0 else nc
    num_c = nc // c_blk

    row_bytes = W_pad * c_blk * jnp.dtype(compute_dtype).itemsize
    th = _pick_row_tile(h_out, row_bytes, k[0]) if s == (1, 1) else None

    out_shape = jax.ShapeDtypeStruct((h_out, w_out, nc), x.dtype)

    if th is not None:
        # Row-tiled path with a (k0-1)-row halo block over the same HBM array.
        num_h = h_out // th
        halo_stride = th // (k[0] - 1)     # halo block-index stride
        kern = functools.partial(_median_pool_kernel, k=k, stride=s,
                                 use_halo=True, compute_dtype=compute_dtype)
        out = pl.pallas_call(
            kern,
            out_shape=out_shape,
            grid=(num_h, num_c),
            in_specs=[
                pl.BlockSpec((th, W_pad, c_blk), lambda h, c: (h, 0, c)),
                pl.BlockSpec((k[0] - 1, W_pad, c_blk),
                             lambda h, c: ((h + 1) * halo_stride, 0, c)),
            ],
            out_specs=pl.BlockSpec((th, w_out, c_blk), lambda h, c: (h, 0, c)),
            compiler_params=pltpu.CompilerParams(
                dimension_semantics=("parallel", "parallel"),
                vmem_limit_bytes=32 * 1024 * 1024,
            ),
        )(x_pad, x_pad)
    else:
        # Fallback: whole padded spatial extent per step (general stride / odd H).
        kern = functools.partial(_median_pool_kernel, k=k, stride=s,
                                 use_halo=False, compute_dtype=compute_dtype)
        out = pl.pallas_call(
            kern,
            out_shape=out_shape,
            grid=(num_c,),
            in_specs=[pl.BlockSpec((H_pad, W_pad, c_blk), lambda c: (0, 0, c))],
            out_specs=pl.BlockSpec((h_out, w_out, c_blk), lambda c: (0, 0, c)),
            compiler_params=pltpu.CompilerParams(
                dimension_semantics=("parallel",),
                vmem_limit_bytes=32 * 1024 * 1024,
            ),
        )(x_pad)

    return jnp.transpose(out, (2, 0, 1)).reshape(N, C, h_out, w_out)


# ------------------------------- reference ----------------------------------
def _reference_median_pool2d(x, kernel_size=3, stride=1, padding=0, same=True):
    k = _pair(kernel_size)
    s = _pair(stride)
    N, C, H, W = x.shape
    if same:
        p_l, p_r, p_t, p_b = _same_padding(H, W, k, s)
    else:
        p_l, p_r, p_t, p_b = _quadruple(padding)
    xp = jnp.pad(x, ((0, 0), (0, 0), (p_t, p_b), (p_l, p_r)), mode="reflect")
    H_pad, W_pad = H + p_t + p_b, W + p_l + p_r
    h_out = (H_pad - k[0]) // s[0] + 1
    w_out = (W_pad - k[1]) // s[1] + 1
    patches = []
    for di in range(k[0]):
        for dj in range(k[1]):
            patches.append(xp[:, :, di:di + (h_out - 1) * s[0] + 1:s[0],
                               dj:dj + (w_out - 1) * s[1] + 1:s[1]])
    stacked = jnp.stack(patches, axis=-1)
    srt = jnp.sort(stacked, axis=-1)
    n = k[0] * k[1]
    return srt[..., (n - 1) // 2]          # lower median, matching torch.median


if __name__ == "__main__":
    key0, key1 = jax.random.split(jax.random.PRNGKey(0))

    # Main case: exercises the row-tiled halo path (grid (2, 1)).
    x = jax.random.normal(key0, (2, 4, 16, 16), dtype=jnp.float32)
    out = jax.block_until_ready(median_pool2d(x))
    ref = _reference_median_pool2d(x)
    assert out.shape == (2, 4, 16, 16)
    assert jnp.allclose(out, ref, atol=1e-6, rtol=1e-6)

    # Odd spatial size: exercises the single-block fallback path.
    x2 = jax.random.normal(key1, (2, 4, 15, 15), dtype=jnp.float32)
    out2 = jax.block_until_ready(median_pool2d(x2))
    ref2 = _reference_median_pool2d(x2)
    assert out2.shape == (2, 4, 15, 15)
    assert jnp.allclose(out2, ref2, atol=1e-6, rtol=1e-6)

    print("KERNEL_OK")
</pallas_src>

<mosaic_0001>
module attributes {stable_mosaic.version = 11 : i64} {
  func.func @_median_pool_kernel(%arg0: i32, %arg1: i32, %arg2: memref<8x18x8xf32, #tpu.memory_space<vmem>>, %arg3: memref<2x18x8xf32, #tpu.memory_space<vmem>>, %arg4: memref<8x16x8xf32, #tpu.memory_space<vmem>>) attributes {dimension_semantics = [#tpu.dimension_semantics<parallel>, #tpu.dimension_semantics<parallel>], iteration_bounds = array<i64: 2, 1>, scalar_prefetch = 0 : i64, scratch_operands = 0 : i64, tpu.core_type = #tpu.core_type<tc>, window_params = [{transform_indices = @transform_0, window_bounds = array<i64: 8, 18, 8>}, {transform_indices = @transform_1, window_bounds = array<i64: 2, 18, 8>}, {transform_indices = @transform_2, window_bounds = array<i64: 8, 16, 8>}]} {
    %c0 = arith.constant 0 : index
    %c0_0 = arith.constant 0 : index
    %c0_1 = arith.constant 0 : index
    %0 = vector.load %arg2[%c0, %c0_0, %c0_1] : memref<8x18x8xf32, #tpu.memory_space<vmem>>, vector<8x18x8xf32>
    %c0_2 = arith.constant 0 : index
    %c0_3 = arith.constant 0 : index
    %c0_4 = arith.constant 0 : index
    %1 = vector.load %arg3[%c0_2, %c0_3, %c0_4] : memref<2x18x8xf32, #tpu.memory_space<vmem>>, vector<2x18x8xf32>
    %2 = tpu.concatenate %0, %1 in 0 : vector<8x18x8xf32>, vector<2x18x8xf32> -> vector<10x18x8xf32>
    %3 = vector.extract_strided_slice %2 {offsets = [0, 0, 0], sizes = [8, 16, 8], strides = [1, 1, 1]} : vector<10x18x8xf32> to vector<8x16x8xf32>
    %4 = vector.extract_strided_slice %2 {offsets = [0, 1, 0], sizes = [8, 16, 8], strides = [1, 1, 1]} : vector<10x18x8xf32> to vector<8x16x8xf32>
    %5 = vector.extract_strided_slice %2 {offsets = [0, 2, 0], sizes = [8, 16, 8], strides = [1, 1, 1]} : vector<10x18x8xf32> to vector<8x16x8xf32>
    %6 = vector.extract_strided_slice %2 {offsets = [1, 0, 0], sizes = [8, 16, 8], strides = [1, 1, 1]} : vector<10x18x8xf32> to vector<8x16x8xf32>
    %7 = vector.extract_strided_slice %2 {offsets = [1, 1, 0], sizes = [8, 16, 8], strides = [1, 1, 1]} : vector<10x18x8xf32> to vector<8x16x8xf32>
    %8 = vector.extract_strided_slice %2 {offsets = [1, 2, 0], sizes = [8, 16, 8], strides = [1, 1, 1]} : vector<10x18x8xf32> to vector<8x16x8xf32>
    %9 = vector.extract_strided_slice %2 {offsets = [2, 0, 0], sizes = [8, 16, 8], strides = [1, 1, 1]} : vector<10x18x8xf32> to vector<8x16x8xf32>
    %10 = vector.extract_strided_slice %2 {offsets = [2, 1, 0], sizes = [8, 16, 8], strides = [1, 1, 1]} : vector<10x18x8xf32> to vector<8x16x8xf32>
    %11 = vector.extract_strided_slice %2 {offsets = [2, 2, 0], sizes = [8, 16, 8], strides = [1, 1, 1]} : vector<10x18x8xf32> to vector<8x16x8xf32>
    %12 = arith.minimumf %4, %5 : vector<8x16x8xf32>
    %13 = arith.maximumf %4, %5 : vector<8x16x8xf32>
    %14 = arith.minimumf %7, %8 : vector<8x16x8xf32>
    %15 = arith.maximumf %7, %8 : vector<8x16x8xf32>
    %16 = arith.minimumf %10, %11 : vector<8x16x8xf32>
    %17 = arith.maximumf %10, %11 : vector<8x16x8xf32>
    %18 = arith.minimumf %3, %12 : vector<8x16x8xf32>
    %19 = arith.maximumf %3, %12 : vector<8x16x8xf32>
    %20 = arith.minimumf %6, %14 : vector<8x16x8xf32>
    %21 = arith.maximumf %6, %14 : vector<8x16x8xf32>
    %22 = arith.minimumf %9, %16 : vector<8x16x8xf32>
    %23 = arith.maximumf %9, %16 : vector<8x16x8xf32>
    %24 = arith.minimumf %19, %13 : vector<8x16x8xf32>
    %25 = arith.maximumf %19, %13 : vector<8x16x8xf32>
    %26 = arith.minimumf %21, %15 : vector<8x16x8xf32>
    %27 = arith.maximumf %21, %15 : vector<8x16x8xf32>
    %28 = arith.minimumf %23, %17 : vector<8x16x8xf32>
    %29 = arith.maximumf %23, %17 : vector<8x16x8xf32>
    %30 = arith.maximumf %18, %20 : vector<8x16x8xf32>
    %31 = arith.minimumf %27, %29 : vector<8x16x8xf32>
    %32 = arith.minimumf %26, %28 : vector<8x16x8xf32>
    %33 = arith.maximumf %26, %28 : vector<8x16x8xf32>
    %34 = arith.maximumf %30, %22 : vector<8x16x8xf32>
    %35 = arith.maximumf %24, %32 : vector<8x16x8xf32>
    %36 = arith.minimumf %25, %31 : vector<8x16x8xf32>
    %37 = arith.minimumf %35, %33 : vector<8x16x8xf32>
    %38 = arith.minimumf %37, %36 : vector<8x16x8xf32>
    %39 = arith.maximumf %37, %36 : vector<8x16x8xf32>
    %40 = arith.maximumf %34, %38 : vector<8x16x8xf32>
    %41 = arith.minimumf %40, %39 : vector<8x16x8xf32>
    %c0_5 = arith.constant 0 : index
    %c0_6 = arith.constant 0 : index
    %c0_7 = arith.constant 0 : index
    %42 = vector.load %arg4[%c0_5, %c0_6, %c0_7] : memref<8x16x8xf32, #tpu.memory_space<vmem>>, vector<8x16x8xf32>
    tpu.vector_store %arg4[%c0_5, %c0_6, %c0_7], %41 {strides = array<i32>} : memref<8x16x8xf32, #tpu.memory_space<vmem>>, vector<8x16x8xf32>,
    return
  }
  func.func @transform_0(%arg0: i32, %arg1: i32) -> (i32, i32, i32) {
    %c0_i32 = arith.constant 0 : i32
    %c0_i32_0 = arith.constant 0 : i32
    return %arg0, %c0_i32, %arg1 : i32, i32, i32
  }
  func.func @transform_1(%arg0: i32, %arg1: i32) -> (i32, i32, i32) {
    %c1_i32 = arith.constant 1 : i32
    %0 = arith.addi %arg0, %c1_i32 : i32
    %c4_i32 = arith.constant 4 : i32
    %1 = arith.muli %0, %c4_i32 : i32
    %c0_i32 = arith.constant 0 : i32
    %c0_i32_0 = arith.constant 0 : i32
    return %1, %c0_i32, %arg1 : i32, i32, i32
  }
  func.func @transform_2(%arg0: i32, %arg1: i32) -> (i32, i32, i32) {
    %c0_i32 = arith.constant 0 : i32
    %c0_i32_0 = arith.constant 0 : i32
    return %arg0, %c0_i32, %arg1 : i32, i32, i32
  }
}

</mosaic_0001>

<bundles_post_ra>
// kernel: tpu_custom_call.1
= control target key start
LH: loop header
LB: loop body
LE: loop exit
PB: predicated region body
PF: predicated region fallthrough
CT: control target
= control target key end

     0   :  { %s1145_s9 = smov 0   ;;  %s1147_s10 = smov 0   ;;  %s1708_s0 = inlined_call_operand.vmem [shape: f32[18,18,8], index: 0, kind: input, shape index: {}]   ;;  %s1709_s1 = inlined_call_operand.vmem [shape: f32[18,18,8], index: 1, kind: input, shape index: {}]   ;;  %s1710_s2 = inlined_call_operand.vmem [shape: f32[16,16,8], index: 2, kind: output, shape index: {}]  }
   0x1   :  { %s1149_s11 = smov 0  }
   0x2 LB: > { %s24_s12 = sadd.s32 1, %s1124_s10  ;;  %p1059_p0 = scmp.ge.s32.totalorder %s1128_s11, 1  ;;  %s1128_s11 = sphi %s1149_s11, %s12_s11   ;;  %s1124_s10 = sphi %s1147_s10, %s1713_s10   ;;  %s1120_s9 = sphi %s1145_s9, %s1712_s9  }
   0x3   : > { %p26_p1 = scmp.ge.s32.totalorder %s24_s12, 2  ;;  %p168_p2 = scmp.lt.s32.totalorder %s1128_s11, 3 }
   0x5   : > { %s1715_s12 = smov (%p26_p1, %s24_s12), 0  ;;  %p169_p3 = pnand %p1059_p0, %p168_p2 }
   0x6   : > { %s1163_s13 = sshll.u32 (!%p169_p3), %s1120_s9, 3 }
   0x7   : > { %172 = sbr.rel (%p169_p3) target bundleno = 151 (0x97), region = 28  ;;  %p220_p4 = scmp.lt.s32.totalorder (!%p169_p3), %s1163_s13, 17 }
   0x8   : > { %p249_p5 = scmp.lt.s32.totalorder (!%p169_p3), %s1163_s13, 15  ;;  %s1079_s24 = sadd.s32 (!%p169_p3), 8, %s1163_s13 }
   0x9   : > { %p1489_p6 = scmp.lt.s32.totalorder (!%p169_p3), %s1079_s24, 17 }
   0xc   : > { %s221_s14 = scalar_select %p220_p4, %s1163_s13, 17  ;;  %vm312_vm0 = vcmask 1046528   ;;  %vm931_vm1 = vcmask 64512  }
   0xd   : > { %s1272_s19 = scalar_select %p249_p5, %s1163_s13, 15 }
   0xe   : > { %s1080_s15 = smul.u32 24, %s221_s14  ;;  %s1717_s24 = smov (!%p1489_p6, %s1079_s24), 17 }
   0xf   : > { %s1077_s20 = sshll.u32 %s1272_s19, 4  ;;  %s1081_s26 = smul.u32 24, %s1717_s24 }
  0x10   : > { %s1170_s18 = scalar_lea.vmem %s1708_s0, %s1080_s15  ;;  %s1306_s23 = scalar_lea.vmem %s1710_s2, %s1077_s20 }
  0x11   : > { %v1173_v0 = vld [vmem:[%s1170_s18] sm:$0xff]  ;;  %v1176_v1 = vld [vmem:[%s1170_s18 + $0x8] sm:$0xff]  ;;  %v1179_v2 = vld [vmem:[%s1170_s18 + $0x10] sm:$0x3]  ;;  %s1554_s29 = scalar_lea.vmem %s1709_s1, %s1081_s26 }
  0x12   : > { %v261_v3 = vld [vmem:[%s1170_s18 + $0x18] sm:$0xff]  ;;  %v1183_v4 = vld [vmem:[%s1170_s18 + $0x20] sm:$0xff]  ;;  %v1186_v5 = vld [vmem:[%s1170_s18 + $0x28] sm:$0x3]  ;;  %v313_v6 = vrot.slane %v1173_v0, 1  ;;  %v314_v7 = vrot.slane %v1176_v1, 1 }
  0x13   : > { %v264_v8 = vld [vmem:[%s1170_s18 + $0x30] sm:$0xff]  ;;  %v1192_v9 = vld [vmem:[%s1170_s18 + $0x38] sm:$0xff]  ;;  %v1195_v10 = vld [vmem:[%s1170_s18 + $0x40] sm:$0x3]  ;;  %v1198_v11 = vrot.slane %v1179_v2, 1  ;;  %v318_v12 = vrot.slane %v261_v3, 1 }
  0x14   : > { %v315_v13 = vsel %vm312_vm0, %v313_v6, %v314_v7  ;;  %v319_v14 = vrot.slane %v1183_v4, 1  ;;  %v1203_v15 = vrot.slane %v1186_v5, 1  ;;  %v323_v16 = vrot.slane %v264_v8, 1 }
  0x15   : > { %v317_v17 = vsel %vm312_vm0, %v314_v7, %v1198_v11  ;;  %v324_v18 = vrot.slane %v1192_v9, 1  ;;  %v1209_v19 = vrot.slane %v1195_v10, 1  ;;  %v377_v20 = vmin.f32 %v1173_v0, %v315_v13 }
  0x16   : > { %v320_v21 = vsel %vm312_vm0, %v318_v12, %v319_v14  ;;  %v322_v22 = vsel %vm312_vm0, %v319_v14, %v1203_v15  ;;  %v378_v23 = vmin.f32 %v1176_v1, %v317_v17  ;;  %v401_v24 = vmax.f32 %v1173_v0, %v315_v13 }
  0x17   : > { %v325_v25 = vsel %vm312_vm0, %v323_v16, %v324_v18  ;;  %v327_v26 = vsel %vm312_vm0, %v324_v18, %v1209_v19  ;;  %v380_v27 = vmin.f32 %v261_v3, %v320_v21  ;;  %v381_v28 = vmin.f32 %v1183_v4, %v322_v22 }
  0x18   : > { %v383_v29 = vmin.f32 %v264_v8, %v325_v25  ;;  %v384_v30 = vmin.f32 %v1192_v9, %v327_v26  ;;  %v402_v31 = vmax.f32 %v1176_v1, %v317_v17  ;;  %v404_v32 = vmax.f32 %v261_v3, %v320_v21 }
  0x19   : > { %v405_v33 = vmax.f32 %v1183_v4, %v322_v22  ;;  %v407_v34 = vmax.f32 %v264_v8, %v325_v25  ;;  %v408_v35 = vmax.f32 %v1192_v9, %v327_v26  ;;  %v483_v36 = vrot.slane %v377_v20, 1 }
  0x1a   : > { %v484_v37 = vrot.slane %v378_v23, 1  ;;  %v488_v38 = vrot.slane %v380_v27, 1  ;;  %v489_v39 = vrot.slane %v381_v28, 1  ;;  %v493_v40 = vrot.slane %v383_v29, 1 }
  0x1b   : > { %v494_v41 = vrot.slane %v384_v30, 1  ;;  %v623_v42 = vrot.slane %v401_v24, 1  ;;  %v624_v43 = vrot.slane %v402_v31, 1  ;;  %v628_v44 = vrot.slane %v404_v32, 1 }
  0x1c   : > { %v485_v45 = vsel %vm312_vm0, %v483_v36, %v484_v37  ;;  %v490_v46 = vsel %vm312_vm0, %v488_v38, %v489_v39  ;;  %v629_v47 = vrot.slane %v405_v33, 1  ;;  %v633_v48 = vrot.slane %v407_v34, 1  ;;  %v267_v36 = vld [vmem:[%s1170_s18 + $0x48] sm:$0xff] }
  0x1d   : > { %v495_v49 = vsel %vm312_vm0, %v493_v40, %v494_v41  ;;  %v539_v50 = vmin.f32 %v1173_v0, %v485_v45  ;;  %v1229_v51 = vmin.f32 %v261_v3, %v490_v46  ;;  %v555_v52 = vmax.f32 %v1173_v0, %v485_v45 }
  0x1e   : > { %v1232_v53 = vmin.f32 %v264_v8, %v495_v49  ;;  %v557_v54 = vmax.f32 %v261_v3, %v490_v46  ;;  %v559_v55 = vmax.f32 %v264_v8, %v495_v49  ;;  %v625_v56 = vsel %vm312_vm0, %v623_v42, %v624_v43  ;;  %v269_v42 = vld [vmem:[%s1170_s18 + $0x58] sm:$0x3] }
  0x1f   : > { %v630_v57 = vsel %vm312_vm0, %v628_v44, %v629_v47  ;;  %v634_v58 = vrot.slane %v408_v35, 1  ;;  %v679_v59 = vmin.f32 %v555_v52, %v625_v56  ;;  %v695_v60 = vmax.f32 %v555_v52, %v625_v56 }
  0x20   : > { %v1236_v61 = vmin.f32 %v557_v54, %v630_v57  ;;  %v1238_v62 = vmax.f32 %v557_v54, %v630_v57  ;;  %v739_v63 = vmax.f32 %v539_v50, %v1229_v51  ;;  %v379_v0 = vmin.f32 %v1179_v2, %v1198_v11 }
  0x21   : > { %v635_v6 = vsel %vm312_vm0, %v633_v48, %v634_v58  ;;  %v382_v3 = vmin.f32 %v1186_v5, %v1203_v15  ;;  %v385_v7 = vmin.f32 %v1195_v10, %v1209_v19  ;;  %v403_v8 = vmax.f32 %v1179_v2, %v1198_v11 }
  0x22   : > { %v1251_v12 = vmin.f32 %v559_v55, %v635_v6  ;;  %v1253_v13 = vmax.f32 %v559_v55, %v635_v6  ;;  %v803_v14 = vmax.f32 %v739_v63, %v1232_v53  ;;  %v406_v16 = vmax.f32 %v1186_v5, %v1203_v15 }
  0x23   : > { %v409_v17 = vmax.f32 %v1195_v10, %v1209_v19  ;;  %v486_v18 = vrot.slane %v379_v0, 1  ;;  %v491_v20 = vrot.slane %v382_v3, 1  ;;  %v496_v21 = vrot.slane %v385_v7, 1  ;;  %v1317_v7 = vld [vmem:[%s1170_s18 + $0x60] sm:$0xff] }
  0x24   : > { %v755_v2 = vmin.f32 %v1238_v62, %v1253_v13  ;;  %v771_v11 = vmin.f32 %v1236_v61, %v1251_v12  ;;  %v787_v22 = vmax.f32 %v1236_v61, %v1251_v12  ;;  %v626_v23 = vrot.slane %v403_v8, 1  ;;  %v1320_v8 = vld [vmem:[%s1170_s18 + $0x68] sm:$0xff] }
  0x25   : > { %v487_v24 = vsel %vm312_vm0, %v484_v37, %v486_v18  ;;  %v492_v5 = vsel %vm312_vm0, %v489_v39, %v491_v20  ;;  %v497_v10 = vsel %vm312_vm0, %v494_v41, %v496_v21  ;;  %v631_v15 = vrot.slane %v406_v16, 1  ;;  %v268_v37 = vld [vmem:[%s1170_s18 + $0x50] sm:$0xff] }
  0x26   : > { %v819_v19 = vmax.f32 %v679_v59, %v771_v11  ;;  %v835_v25 = vmin.f32 %v695_v60, %v755_v2  ;;  %v540_v26 = vmin.f32 %v1176_v1, %v487_v24  ;;  %v1276_v27 = vmin.f32 %v1183_v4, %v492_v5 }
  0x27   : > { %v1279_v28 = vmin.f32 %v1192_v9, %v497_v10  ;;  %v556_v29 = vmax.f32 %v1176_v1, %v487_v24  ;;  %v558_v30 = vmax.f32 %v1183_v4, %v492_v5  ;;  %v560_v31 = vmax.f32 %v1192_v9, %v497_v10 }
  0x28   : > { %v851_v32 = vmin.f32 %v819_v19, %v787_v22  ;;  %v627_v33 = vsel %vm312_vm0, %v624_v43, %v626_v23  ;;  %v632_v34 = vsel %vm312_vm0, %v629_v47, %v631_v15  ;;  %v636_v35 = vrot.slane %v409_v17, 1 }
  0x29   : > { %v680_v38 = vmin.f32 %v556_v29, %v627_v33  ;;  %v1288_v39 = vmin.f32 %v558_v30, %v632_v34  ;;  %v696_v40 = vmax.f32 %v556_v29, %v627_v33  ;;  %v1290_v41 = vmax.f32 %v558_v30, %v632_v34 }
  0x2a   : > { %v867_v1 = vmin.f32 %v851_v32, %v835_v25  ;;  %v883_v4 = vmax.f32 %v851_v32, %v835_v25  ;;  %v637_v9 = vsel %vm312_vm0, %v634_v58, %v636_v35  ;;  %v740_v44 = vmax.f32 %v540_v26, %v1276_v27  ;;  %v272_v26 = vld [vmem:[%s1170_s18 + $0x70] sm:$0x3] }
  0x2b   : > { %v1296_v43 = vmin.f32 %v560_v31, %v637_v9  ;;  %v1298_v45 = vmax.f32 %v560_v31, %v637_v9  ;;  %v328_v46 = vrot.slane %v267_v36, 1  ;;  %v329_v47 = vrot.slane %v268_v37, 1 }
  0x2c   : > { %v899_v48 = vmax.f32 %v803_v14, %v867_v1  ;;  %v804_v49 = vmax.f32 %v740_v44, %v1279_v28  ;;  %v331_v50 = vrot.slane %v269_v42, 1  ;;  %v741_v52 = vmax.f32 %v1229_v51, %v1232_v53 }
  0x2d   : > { %v756_v54 = vmin.f32 %v1290_v41, %v1298_v45  ;;  %v772_v55 = vmin.f32 %v1288_v39, %v1296_v43  ;;  %v788_v56 = vmax.f32 %v1288_v39, %v1296_v43  ;;  %v330_v57 = vsel %vm312_vm0, %v328_v46, %v329_v47 }
  0x2e   : > { %v915_v58 = vmin.f32 %v899_v48, %v883_v4  ;;  %v332_v51 = vsel %vm312_vm0, %v329_v47, %v331_v50  ;;  %v386_v59 = vmin.f32 %v267_v36, %v330_v57  ;;  %v410_v60 = vmax.f32 %v267_v36, %v330_v57 }
  0x2f   : > { %v820_v63 = vmax.f32 %v680_v38, %v772_v55  ;;  %v836_v0 = vmin.f32 %v696_v40, %v756_v54  ;;  %v387_v6 = vmin.f32 %v268_v37, %v332_v51  ;;  %v411_v3 = vmax.f32 %v268_v37, %v332_v51 }
  0x30   : > { %932 = vst.msk [vmem:[%s1306_s23] sm:$0xff] %vm931_vm1, %v915_v58  ;;  %v498_v14 = vrot.slane %v386_v59, 1  ;;  %v638_v16 = vrot.slane %v410_v60, 1  ;;  %v388_v17 = vmin.f32 %v269_v42, %v331_v50  ;;  %v412_v18 = vmax.f32 %v269_v42, %v331_v50 }
  0x31   : > { %v852_v20 = vmin.f32 %v820_v63, %v788_v56  ;;  %v499_v21 = vrot.slane %v387_v6, 1  ;;  %v639_v2 = vrot.slane %v411_v3, 1  ;;  %v742_v11 = vmax.f32 %v1276_v27, %v1279_v28 }
  0x32   : > { %v501_v22 = vrot.slane %v388_v17, 1  ;;  %v641_v23 = vrot.slane %v412_v18, 1  ;;  %v333_v24 = vrot.slane %v1317_v7, 1  ;;  %v334_v5 = vrot.slane %v1320_v8, 1 }
  0x33   : > { %v868_v10 = vmin.f32 %v852_v20, %v836_v0  ;;  %v884_v15 = vmax.f32 %v852_v20, %v836_v0  ;;  %v500_v19 = vsel %vm312_vm0, %v498_v14, %v499_v21  ;;  %v640_v25 = vsel %vm312_vm0, %v638_v16, %v639_v2 }
  0x34   : > { %v1331_v29 = vmin.f32 %v267_v36, %v500_v19  ;;  %v561_v30 = vmax.f32 %v267_v36, %v500_v19  ;;  %v502_v31 = vsel %vm312_vm0, %v499_v21, %v501_v22  ;;  %v642_v27 = vsel %vm312_vm0, %v639_v2, %v641_v23  ;;  %v273_v22 = vld [vmem:[%s1170_s18 + $0x78] sm:$0xff] }
  0x35   : > { %v900_v32 = vmax.f32 %v804_v49, %v868_v10  ;;  %v1335_v33 = vmin.f32 %v268_v37, %v502_v31  ;;  %v562_v34 = vmax.f32 %v268_v37, %v502_v31  ;;  %v335_v35 = vsel %vm312_vm0, %v333_v24, %v334_v5 }
  0x36   : > { %v1338_v38 = vmin.f32 %v561_v30, %v640_v25  ;;  %v1340_v40 = vmax.f32 %v561_v30, %v640_v25  ;;  %v805_v42 = vmax.f32 %v741_v52, %v1331_v29  ;;  %v336_v1 = vrot.slane %v272_v26, 1  ;;  %v275_v30 = vld [vmem:[%s1170_s18 + $0x88] sm:$0x3] }
  0x37   : > { %v916_v4 = vmin.f32 %v900_v32, %v884_v15  ;;  %v1343_v36 = vmin.f32 %v562_v34, %v642_v27  ;;  %v1345_v9 = vmax.f32 %v562_v34, %v642_v27  ;;  %v806_v44 = vmax.f32 %v742_v11, %v1335_v33  ;;  %v1394_v34 = vld [vmem:[%s1170_s18 + $0x90] sm:$0xff] }
  0x38   : > { %v757_v46 = vmin.f32 %v1253_v13, %v1340_v40  ;;  %v773_v37 = vmin.f32 %v1251_v12, %v1338_v38  ;;  %v789_v47 = vmax.f32 %v1251_v12, %v1338_v38  ;;  %v337_v48 = vsel %vm312_vm0, %v334_v5, %v336_v1 }
  0x39   : > { %933 = vst.msk [vmem:[%s1306_s23 + $0x8] sm:$0xff] %vm931_vm1, %v916_v4  ;;  %v758_v49 = vmin.f32 %v1298_v45, %v1345_v9  ;;  %v774_v50 = vmin.f32 %v1296_v43, %v1343_v36  ;;  %v790_v52 = vmax.f32 %v1296_v43, %v1343_v36  ;;  %v389_v54 = vmin.f32 %v1317_v7, %v335_v35 }
  0x3a   : > { %v821_v55 = vmax.f32 %v1236_v61, %v773_v37  ;;  %v837_v56 = vmin.f32 %v1238_v62, %v757_v46  ;;  %v390_v57 = vmin.f32 %v1320_v8, %v337_v48  ;;  %v413_v58 = vmax.f32 %v1317_v7, %v335_v35 }
  0x3b   : > { %v822_v51 = vmax.f32 %v1288_v39, %v774_v50  ;;  %v838_v59 = vmin.f32 %v1290_v41, %v758_v49  ;;  %v414_v60 = vmax.f32 %v1320_v8, %v337_v48  ;;  %v503_v63 = vrot.slane %v389_v54, 1 }
  0x3c   : > { %v853_v0 = vmin.f32 %v821_v55, %v789_v47  ;;  %v504_v6 = vrot.slane %v390_v57, 1  ;;  %v643_v3 = vrot.slane %v413_v58, 1  ;;  %v743_v61 = vmax.f32 %v1232_v53, %v1331_v29 }
  0x3d   : > { %v854_v14 = vmin.f32 %v822_v51, %v790_v52  ;;  %v644_v62 = vrot.slane %v414_v60, 1  ;;  %v391_v16 = vmin.f32 %v272_v26, %v336_v1  ;;  %v415_v17 = vmax.f32 %v272_v26, %v336_v1  ;;  %v1388_v26 = vld [vmem:[%s1170_s18 + $0x80] sm:$0xff] }
  0x3e   : > { %v869_v18 = vmin.f32 %v853_v0, %v837_v56  ;;  %v885_v20 = vmax.f32 %v853_v0, %v837_v56  ;;  %v505_v39 = vsel %vm312_vm0, %v503_v63, %v504_v6  ;;  %v744_v41 = vmax.f32 %v1279_v28, %v1335_v33 }
  0x3f   : > { %v870_v21 = vmin.f32 %v854_v14, %v838_v59  ;;  %v886_v2 = vmax.f32 %v854_v14, %v838_v59  ;;  %v1377_v11 = vmin.f32 %v1317_v7, %v505_v39  ;;  %v563_v53 = vmax.f32 %v1317_v7, %v505_v39 }
  0x40   : > { %v901_v23 = vmax.f32 %v805_v42, %v869_v18  ;;  %v645_v24 = vsel %vm312_vm0, %v643_v3, %v644_v62  ;;  %v506_v5 = vrot.slane %v391_v16, 1  ;;  %v646_v10 = vrot.slane %v415_v17, 1 }
  0x41   : > { %v902_v15 = vmax.f32 %v806_v44, %v870_v21  ;;  %v1382_v19 = vmin.f32 %v563_v53, %v645_v24  ;;  %v1384_v25 = vmax.f32 %v563_v53, %v645_v24  ;;  %v807_v28 = vmax.f32 %v743_v61, %v1377_v11  ;;  %v1432_v61 = vld [vmem:[%s1170_s18 + $0x98] sm:$0xff] }
  0x42   : > { %v917_v7 = vmin.f32 %v901_v23, %v885_v20  ;;  %v507_v31 = vsel %vm312_vm0, %v504_v6, %v506_v5  ;;  %v647_v27 = vsel %vm312_vm0, %v644_v62, %v646_v10  ;;  %v338_v32 = vrot.slane %v273_v22, 1  ;;  %v278_v10 = vld [vmem:[%s1170_s18 + $0xa0] sm:$0x3] }
  0x43   : > { %v918_v35 = vmin.f32 %v902_v15, %v886_v2  ;;  %v759_v42 = vmin.f32 %v1340_v40, %v1384_v25  ;;  %v775_v1 = vmin.f32 %v1338_v38, %v1382_v19  ;;  %v791_v4 = vmax.f32 %v1338_v38, %v1382_v19 }
  0x44   : > { %934 = vst.msk [vmem:[%s1306_s23 + $0x10] sm:$0xff] %vm931_vm1, %v917_v7  ;;  %v1405_v44 = vmin.f32 %v1320_v8, %v507_v31  ;;  %v564_v46 = vmax.f32 %v1320_v8, %v507_v31  ;;  %v339_v37 = vrot.slane %v1388_v26, 1  ;;  %v341_v47 = vrot.slane %v275_v30, 1 }
  0x45   : > { %935 = vst.msk [vmem:[%s1306_s23 + $0x18] sm:$0xff] %vm931_vm1, %v918_v35  ;;  %v823_v48 = vmax.f32 %v1251_v12, %v775_v1  ;;  %v839_v49 = vmin.f32 %v1253_v13, %v759_v42  ;;  %v745_v50 = vmax.f32 %v1331_v29, %v1377_v11  ;;  %v343_v52 = vrot.slane %v1394_v34, 1 }
  0x46   : > { %v1416_v54 = vmin.f32 %v564_v46, %v647_v27  ;;  %v1418_v55 = vmax.f32 %v564_v46, %v647_v27  ;;  %v808_v8 = vmax.f32 %v744_v41, %v1405_v44  ;;  %v340_v56 = vsel %vm312_vm0, %v338_v32, %v339_v37 }
  0x47   : > { %v855_v57 = vmin.f32 %v823_v48, %v791_v4  ;;  %v342_v58 = vsel %vm312_vm0, %v339_v37, %v341_v47  ;;  %v392_v12 = vmin.f32 %v273_v22, %v340_v56  ;;  %v416_v51 = vmax.f32 %v273_v22, %v340_v56 }
  0x48   : > { %v760_v13 = vmin.f32 %v1345_v9, %v1418_v55  ;;  %v776_v29 = vmin.f32 %v1343_v36, %v1416_v54  ;;  %v792_v59 = vmax.f32 %v1343_v36, %v1416_v54  ;;  %v393_v60 = vmin.f32 %v1388_v26, %v342_v58 }
  0x49   : > { %v871_v63 = vmin.f32 %v855_v57, %v839_v49  ;;  %v887_v0 = vmax.f32 %v855_v57, %v839_v49  ;;  %v417_v6 = vmax.f32 %v1388_v26, %v342_v58  ;;  %v508_v3 = vrot.slane %v392_v12, 1 }
  0x4a   : > { %v824_v14 = vmax.f32 %v1296_v43, %v776_v29  ;;  %v840_v62 = vmin.f32 %v1298_v45, %v760_v13  ;;  %v509_v16 = vrot.slane %v393_v60, 1  ;;  %v648_v17 = vrot.slane %v416_v51, 1 }
  0x4b   : > { %v903_v18 = vmax.f32 %v807_v28, %v871_v63  ;;  %v649_v20 = vrot.slane %v417_v6, 1  ;;  %v394_v39 = vmin.f32 %v275_v30, %v341_v47  ;;  %v418_v41 = vmax.f32 %v275_v30, %v341_v47 }
  0x4c   : > { %v856_v21 = vmin.f32 %v824_v14, %v792_v59  ;;  %v510_v2 = vsel %vm312_vm0, %v508_v3, %v509_v16  ;;  %v746_v53 = vmax.f32 %v1335_v33, %v1405_v44  ;;  %v344_v23 = vrot.slane %v1432_v61, 1 }
  0x4d   : > { %v919_v24 = vmin.f32 %v903_v18, %v887_v0  ;;  %v1440_v43 = vmin.f32 %v273_v22, %v510_v2  ;;  %v565_v5 = vmax.f32 %v273_v22, %v510_v2  ;;  %v650_v45 = vsel %vm312_vm0, %v648_v17, %v649_v20 }
  0x4e   : > { %v872_v15 = vmin.f32 %v856_v21, %v840_v62  ;;  %v888_v28 = vmax.f32 %v856_v21, %v840_v62  ;;  %v511_v7 = vrot.slane %v394_v39, 1  ;;  %v651_v31 = vrot.slane %v418_v41, 1 }
  0x4f   : > { %936 = vst.msk [vmem:[%s1306_s23 + $0x20] sm:$0xff] %vm931_vm1, %v919_v24  ;;  %v1446_v30 = vmin.f32 %v565_v5, %v650_v45  ;;  %v1448_v27 = vmax.f32 %v565_v5, %v650_v45  ;;  %v809_v33 = vmax.f32 %v745_v50, %v1440_v43  ;;  %v345_v32 = vsel %vm312_vm0, %v343_v52, %v344_v23 }
  0x50   : > { %v904_v35 = vmax.f32 %v808_v8, %v872_v15  ;;  %v512_v22 = vsel %vm312_vm0, %v509_v16, %v511_v7  ;;  %v652_v42 = vsel %vm312_vm0, %v649_v20, %v651_v31  ;;  %v346_v1 = vrot.slane %v278_v10, 1 }
  0x51   : > { %v761_v4 = vmin.f32 %v1384_v25, %v1448_v27  ;;  %v777_v46 = vmin.f32 %v1382_v19, %v1446_v30  ;;  %v793_v37 = vmax.f32 %v1382_v19, %v1446_v30  ;;  %v1461_v47 = vmin.f32 %v1388_v26, %v512_v22 }
  0x52   : > { %v920_v48 = vmin.f32 %v904_v35, %v888_v28  ;;  %v566_v49 = vmax.f32 %v1388_v26, %v512_v22  ;;  %v347_v50 = vsel %vm312_vm0, %v344_v23, %v346_v1  ;;  %v395_v52 = vmin.f32 %v1394_v34, %v345_v32 }
  0x53   : > { %v825_v8 = vmax.f32 %v1338_v38, %v777_v46  ;;  %v841_v56 = vmin.f32 %v1340_v40, %v761_v4  ;;  %v810_v57 = vmax.f32 %v746_v53, %v1461_v47  ;;  %v396_v58 = vmin.f32 %v1432_v61, %v347_v50 }
  0x54   : > { %937 = vst.msk [vmem:[%s1306_s23 + $0x28] sm:$0xff] %vm931_vm1, %v920_v48  ;;  %v1473_v12 = vmin.f32 %v566_v49, %v652_v42  ;;  %v1475_v51 = vmax.f32 %v566_v49, %v652_v42  ;;  %v419_v26 = vmax.f32 %v1394_v34, %v345_v32  ;;  %v420_v13 = vmax.f32 %v1432_v61, %v347_v50  ;;  %v281_v32 = vld [vmem:[%s1170_s18 + $0xb8] sm:$0x3] }
  0x55   : > { %v857_v29 = vmin.f32 %v825_v8, %v793_v37  ;;  %v513_v38 = vrot.slane %v395_v52, 1  ;;  %v514_v59 = vrot.slane %v396_v58, 1  ;;  %v747_v40 = vmax.f32 %v1377_v11, %v1440_v43 }
  0x56   : > { %v762_v60 = vmin.f32 %v1418_v55, %v1475_v51  ;;  %v778_v63 = vmin.f32 %v1416_v54, %v1473_v12  ;;  %v794_v0 = vmax.f32 %v1416_v54, %v1473_v12  ;;  %v653_v6 = vrot.slane %v419_v26, 1 }
  0x57   : > { %v873_v3 = vmin.f32 %v857_v29, %v841_v56  ;;  %v889_v14 = vmax.f32 %v857_v29, %v841_v56  ;;  %v515_v11 = vsel %vm312_vm0, %v513_v38, %v514_v59  ;;  %v654_v62 = vrot.slane %v420_v13, 1 }
  0x58   : > { %v826_v16 = vmax.f32 %v1343_v36, %v778_v63  ;;  %v842_v17 = vmin.f32 %v1345_v9, %v762_v60  ;;  %v1497_v18 = vmin.f32 %v1394_v34, %v515_v11  ;;  %v567_v20 = vmax.f32 %v1394_v34, %v515_v11  ;;  %v279_v9 = vld [vmem:[%s1170_s18 + $0xa8] sm:$0xff] }
  0x59   : > { %v905_v39 = vmax.f32 %v809_v33, %v873_v3  ;;  %v655_v41 = vsel %vm312_vm0, %v653_v6, %v654_v62  ;;  %v397_v21 = vmin.f32 %v278_v10, %v346_v1  ;;  %v421_v2 = vmax.f32 %v278_v10, %v346_v1  ;;  %v1520_v33 = vld [vmem:[%s1170_s18 + $0xb0] sm:$0xff] }
  0x5a   : > { %v858_v53 = vmin.f32 %v826_v16, %v794_v0  ;;  %v1501_v23 = vmin.f32 %v567_v20, %v655_v41  ;;  %v1503_v24 = vmax.f32 %v567_v20, %v655_v41  ;;  %v811_v36 = vmax.f32 %v747_v40, %v1497_v18  ;;  %v1569_v20 = vld [vmem:[%s1554_s29 + $0x8] sm:$0xff] }
  0x5b   : > { %v921_v34 = vmin.f32 %v905_v39, %v889_v14  ;;  %v516_v5 = vrot.slane %v397_v21, 1  ;;  %v656_v45 = vrot.slane %v421_v2, 1  ;;  %v748_v10 = vmax.f32 %v1405_v44, %v1461_v47 }
  0x5c   : > { %v874_v15 = vmin.f32 %v858_v53, %v842_v17  ;;  %v890_v28 = vmax.f32 %v858_v53, %v842_v17  ;;  %v763_v7 = vmin.f32 %v1448_v27, %v1503_v24  ;;  %v779_v31 = vmin.f32 %v1446_v30, %v1501_v23  ;;  %v1566_v17 = vld [vmem:[%s1554_s29] sm:$0xff] }
  0x5d   : > { %938 = vst.msk [vmem:[%s1306_s23 + $0x30] sm:$0xff] %vm931_vm1, %v921_v34  ;;  %v795_v35 = vmax.f32 %v1446_v30, %v1501_v23  ;;  %v517_v22 = vsel %vm312_vm0, %v514_v59, %v516_v5  ;;  %v657_v44 = vsel %vm312_vm0, %v654_v62, %v656_v45  ;;  %v348_v42 = vrot.slane %v279_v9, 1 }
  0x5e   : > { %v906_v1 = vmax.f32 %v810_v57, %v874_v15  ;;  %v827_v4 = vmax.f32 %v1382_v19, %v779_v31  ;;  %v843_v46 = vmin.f32 %v1384_v25, %v763_v7  ;;  %v1532_v37 = vmin.f32 %v1432_v61, %v517_v22 }
  0x5f   : > { %v568_v48 = vmax.f32 %v1432_v61, %v517_v22  ;;  %v349_v49 = vrot.slane %v1520_v33, 1  ;;  %v351_v50 = vrot.slane %v281_v32, 1  ;;  %v749_v52 = vmax.f32 %v1440_v43, %v1497_v18 }
  0x60   : > { %v922_v8 = vmin.f32 %v906_v1, %v890_v28  ;;  %v859_v56 = vmin.f32 %v827_v4, %v795_v35  ;;  %v812_v57 = vmax.f32 %v748_v10, %v1532_v37  ;;  %v750_v19 = vmax.f32 %v1461_v47, %v1532_v37 }
  0x61   : > { %v1542_v25 = vmin.f32 %v568_v48, %v657_v44  ;;  %v1544_v58 = vmax.f32 %v568_v48, %v657_v44  ;;  %v350_v26 = vsel %vm312_vm0, %v348_v42, %v349_v49  ;;  %v352_v61 = vsel %vm312_vm0, %v349_v49, %v351_v50 }
  0x62   : > { %939 = vst.msk [vmem:[%s1306_s23 + $0x38] sm:$0xff] %vm931_vm1, %v922_v8  ;;  %v875_v13 = vmin.f32 %v859_v56, %v843_v46  ;;  %v891_v29 = vmax.f32 %v859_v56, %v843_v46  ;;  %v398_v43 = vmin.f32 %v279_v9, %v350_v26  ;;  %v399_v38 = vmin.f32 %v1520_v33, %v352_v61 }
  0x63   : > { %v764_v47 = vmin.f32 %v1475_v51, %v1544_v58  ;;  %v780_v59 = vmin.f32 %v1473_v12, %v1542_v25  ;;  %v796_v40 = vmax.f32 %v1473_v12, %v1542_v25  ;;  %v422_v60 = vmax.f32 %v279_v9, %v350_v26 }
  0x64   : > { %v907_v63 = vmax.f32 %v811_v36, %v875_v13  ;;  %v423_v0 = vmax.f32 %v1520_v33, %v352_v61  ;;  %v518_v6 = vrot.slane %v398_v43, 1  ;;  %v519_v3 = vrot.slane %v399_v38, 1 }
  0x65   : > { %v828_v14 = vmax.f32 %v1416_v54, %v780_v59  ;;  %v844_v11 = vmin.f32 %v1418_v55, %v764_v47  ;;  %v658_v62 = vrot.slane %v422_v60, 1  ;;  %v400_v16 = vmin.f32 %v281_v32, %v351_v50 }
  0x66   : > { %v923_v39 = vmin.f32 %v907_v63, %v891_v29  ;;  %v520_v41 = vsel %vm312_vm0, %v518_v6, %v519_v3  ;;  %v659_v21 = vrot.slane %v423_v0, 1  ;;  %v424_v2 = vmax.f32 %v281_v32, %v351_v50  ;;  %v284_v32 = vld [vmem:[%s1554_s29 + $0x10] sm:$0x3] }
  0x67   : > { %v860_v53 = vmin.f32 %v828_v14, %v796_v40  ;;  %v1572_v36 = vmin.f32 %v279_v9, %v520_v41  ;;  %v569_v34 = vmax.f32 %v279_v9, %v520_v41  ;;  %v521_v5 = vrot.slane %v400_v16, 1  ;;  %v1623_v16 = vld [vmem:[%s1554_s29 + $0x18] sm:$0xff] }
  0x68   : > { %940 = vst.msk [vmem:[%s1306_s23 + $0x40] sm:$0xff] %vm931_vm1, %v923_v39  ;;  %v660_v54 = vsel %vm312_vm0, %v658_v62, %v659_v21  ;;  %v661_v55 = vrot.slane %v424_v2, 1  ;;  %v428_v45 = vrot.slane %v1566_v17, 1  ;;  %v429_v10 = vrot.slane %v1569_v20, 1 }
  0x69   : > { %v876_v15 = vmin.f32 %v860_v53, %v844_v11  ;;  %v892_v28 = vmax.f32 %v860_v53, %v844_v11  ;;  %v1579_v7 = vmin.f32 %v569_v34, %v660_v54  ;;  %v1581_v31 = vmax.f32 %v569_v34, %v660_v54 }
  0x6a   : > { %v813_v35 = vmax.f32 %v749_v52, %v1572_v36  ;;  %v522_v9 = vsel %vm312_vm0, %v519_v3, %v521_v5  ;;  %v662_v22 = vsel %vm312_vm0, %v659_v21, %v661_v55  ;;  %v430_v44 = vsel %vm312_vm0, %v428_v45, %v429_v10  ;;  %v1632_v5 = vld [vmem:[%s1554_s29 + $0x20] sm:$0xff] }
  0x6b   : > { %v908_v42 = vmax.f32 %v812_v57, %v876_v15  ;;  %v765_v1 = vmin.f32 %v1503_v24, %v1581_v31  ;;  %v781_v4 = vmin.f32 %v1501_v23, %v1579_v7  ;;  %v797_v46 = vmax.f32 %v1501_v23, %v1579_v7 }
  0x6c   : > { %v1595_v48 = vmin.f32 %v1520_v33, %v522_v9  ;;  %v570_v49 = vmax.f32 %v1520_v33, %v522_v9  ;;  %v431_v50 = vrot.slane %v284_v32, 1  ;;  %v436_v52 = vmin.f32 %v1566_v17, %v430_v44 }
  0x6d   : > { %v924_v8 = vmin.f32 %v908_v42, %v892_v28  ;;  %v829_v56 = vmax.f32 %v1446_v30, %v781_v4  ;;  %v845_v57 = vmin.f32 %v1448_v27, %v765_v1  ;;  %v439_v26 = vmax.f32 %v1566_v17, %v430_v44 }
  0x6e   : > { %v1602_v61 = vmin.f32 %v570_v49, %v662_v22  ;;  %v1604_v13 = vmax.f32 %v570_v49, %v662_v22  ;;  %v814_v29 = vmax.f32 %v750_v19, %v1595_v48  ;;  %v432_v43 = vsel %vm312_vm0, %v429_v10, %v431_v50 }
  0x6f   : > { %941 = vst.msk [vmem:[%s1306_s23 + $0x48] sm:$0xff] %vm931_vm1, %v924_v8  ;;  %v861_v33 = vmin.f32 %v829_v56, %v797_v46  ;;  %v437_v38 = vmin.f32 %v1569_v20, %v432_v43  ;;  %v440_v30 = vmax.f32 %v1569_v20, %v432_v43  ;;  %v574_v47 = vrot.slane %v436_v52, 1 }
  0x70   : > { %v766_v27 = vmin.f32 %v1544_v58, %v1604_v13  ;;  %v782_v59 = vmin.f32 %v1542_v25, %v1602_v61  ;;  %v798_v19 = vmax.f32 %v1542_v25, %v1602_v61  ;;  %v714_v40 = vrot.slane %v439_v26, 1 }
  0x71   : > { %v877_v60 = vmin.f32 %v861_v33, %v845_v57  ;;  %v893_v63 = vmax.f32 %v861_v33, %v845_v57  ;;  %v575_v0 = vrot.slane %v437_v38, 1  ;;  %v715_v6 = vrot.slane %v440_v30, 1 }
  0x72   : > { %v830_v3 = vmax.f32 %v1473_v12, %v782_v59  ;;  %v846_v14 = vmin.f32 %v1475_v51, %v766_v27  ;;  %v751_v11 = vmax.f32 %v1497_v18, %v1572_v36  ;;  %v438_v62 = vmin.f32 %v284_v32, %v431_v50 }
  0x73   : > { %v909_v39 = vmax.f32 %v813_v35, %v877_v60  ;;  %v576_v41 = vsel %vm312_vm0, %v574_v47, %v575_v0  ;;  %v716_v21 = vsel %vm312_vm0, %v714_v40, %v715_v6  ;;  %v441_v2 = vmax.f32 %v284_v32, %v431_v50  ;;  %v287_v35 = vld [vmem:[%s1554_s29 + $0x28] sm:$0x3] }
  0x74   : > { %v862_v53 = vmin.f32 %v830_v3, %v798_v19  ;;  %v1628_v34 = vmin.f32 %v1566_v17, %v576_v41  ;;  %v583_v12 = vmax.f32 %v1566_v17, %v576_v41  ;;  %v577_v51 = vrot.slane %v438_v62, 1 }
  0x75   : > { %v925_v18 = vmin.f32 %v909_v39, %v893_v63  ;;  %v717_v54 = vrot.slane %v441_v2, 1  ;;  %v752_v55 = vmax.f32 %v1532_v37, %v1595_v48  ;;  %v445_v45 = vrot.slane %v1623_v16, 1 }
  0x76   : > { %v878_v10 = vmin.f32 %v862_v53, %v846_v14  ;;  %v894_v15 = vmax.f32 %v862_v53, %v846_v14  ;;  %v1637_v28 = vmin.f32 %v583_v12, %v716_v21  ;;  %v723_v32 = vmax.f32 %v583_v12, %v716_v21 }
  0x77   : > { %942 = vst.msk [vmem:[%s1306_s23 + $0x50] sm:$0xff] %vm931_vm1, %v925_v18  ;;  %v815_v17 = vmax.f32 %v751_v11, %v1628_v34  ;;  %v578_v9 = vsel %vm312_vm0, %v575_v0, %v577_v51  ;;  %v718_v22 = vsel %vm312_vm0, %v715_v6, %v717_v54  ;;  %v446_v44 = vrot.slane %v1632_v5, 1 }
  0x78   : > { %v910_v42 = vmax.f32 %v814_v29, %v878_v10  ;;  %v767_v37 = vmin.f32 %v1581_v31, %v723_v32  ;;  %v783_v1 = vmin.f32 %v1579_v7, %v1637_v28  ;;  %v799_v4 = vmax.f32 %v1579_v7, %v1637_v28 }
  0x79   : > { %v582_v46 = vmin.f32 %v1569_v20, %v578_v9  ;;  %v584_v49 = vmax.f32 %v1569_v20, %v578_v9  ;;  %v447_v50 = vsel %vm312_vm0, %v445_v45, %v446_v44  ;;  %v448_v52 = vrot.slane %v287_v35, 1 }
  0x7a   : > { %v926_v8 = vmin.f32 %v910_v42, %v894_v15  ;;  %v831_v56 = vmax.f32 %v1501_v23, %v783_v1  ;;  %v847_v57 = vmin.f32 %v1503_v24, %v767_v37  ;;  %v453_v26 = vmin.f32 %v1623_v16, %v447_v50 }
  0x7b   : > { %v1657_v29 = vmin.f32 %v584_v49, %v718_v22  ;;  %v724_v43 = vmax.f32 %v584_v49, %v718_v22  ;;  %v816_v33 = vmax.f32 %v752_v55, %v582_v46  ;;  %v449_v38 = vsel %vm312_vm0, %v446_v44, %v448_v52 }
  0x7c   : > { %943 = vst.msk [vmem:[%s1306_s23 + $0x58] sm:$0xff] %vm931_vm1, %v926_v8  ;;  %v863_v30 = vmin.f32 %v831_v56, %v799_v4  ;;  %v454_v20 = vmin.f32 %v1632_v5, %v449_v38  ;;  %v456_v47 = vmax.f32 %v1623_v16, %v447_v50  ;;  %v457_v27 = vmax.f32 %v1632_v5, %v449_v38 }
  0x7d   : > { %v768_v23 = vmin.f32 %v1604_v13, %v724_v43  ;;  %v784_v24 = vmin.f32 %v1602_v61, %v1657_v29  ;;  %v800_v59 = vmax.f32 %v1602_v61, %v1657_v29  ;;  %v588_v19 = vrot.slane %v453_v26, 1 }
  0x7e   : > { %v879_v40 = vmin.f32 %v863_v30, %v847_v57  ;;  %v895_v60 = vmax.f32 %v863_v30, %v847_v57  ;;  %v589_v63 = vrot.slane %v454_v20, 1  ;;  %v728_v0 = vrot.slane %v456_v47, 1 }
  0x7f   : > { %v832_v6 = vmax.f32 %v1542_v25, %v784_v24  ;;  %v848_v3 = vmin.f32 %v1544_v58, %v768_v23  ;;  %v729_v14 = vrot.slane %v457_v27, 1  ;;  %v753_v11 = vmax.f32 %v1572_v36, %v1628_v34 }
  0x80   : > { %v911_v62 = vmax.f32 %v815_v17, %v879_v40  ;;  %v590_v39 = vsel %vm312_vm0, %v588_v19, %v589_v63  ;;  %v455_v41 = vmin.f32 %v287_v35, %v448_v52  ;;  %v458_v21 = vmax.f32 %v287_v35, %v448_v52 }
  0x81   : > { %v864_v2 = vmin.f32 %v832_v6, %v800_v59  ;;  %v595_v53 = vmin.f32 %v1623_v16, %v590_v39  ;;  %v597_v12 = vmax.f32 %v1623_v16, %v590_v39  ;;  %v730_v51 = vsel %vm312_vm0, %v728_v0, %v729_v14 }
  0x82   : > { %v927_v25 = vmin.f32 %v911_v62, %v895_v60  ;;  %v591_v18 = vrot.slane %v455_v41, 1  ;;  %v731_v58 = vrot.slane %v458_v21, 1  ;;  %v754_v54 = vmax.f32 %v1595_v48, %v582_v46 }
  0x83   : > { %v880_v55 = vmin.f32 %v864_v2, %v848_v3  ;;  %v896_v36 = vmax.f32 %v864_v2, %v848_v3  ;;  %v735_v34 = vmin.f32 %v597_v12, %v730_v51  ;;  %v737_v45 = vmax.f32 %v597_v12, %v730_v51 }
  0x84   : > { %944 = vst.msk [vmem:[%s1306_s23 + $0x60] sm:$0xff] %vm931_vm1, %v927_v25  ;;  %v817_v10 = vmax.f32 %v753_v11, %v595_v53  ;;  %v592_v15 = vsel %vm312_vm0, %v589_v63, %v591_v18  ;;  %v732_v35 = vsel %vm312_vm0, %v729_v14, %v731_v58 }
  0x85   : > { %v912_v16 = vmax.f32 %v816_v33, %v880_v55  ;;  %v769_v17 = vmin.f32 %v723_v32, %v737_v45  ;;  %v785_v9 = vmin.f32 %v1637_v28, %v735_v34  ;;  %v801_v22 = vmax.f32 %v1637_v28, %v735_v34 }
  0x86   : > { %v596_v48 = vmin.f32 %v1632_v5, %v592_v15  ;;  %v598_v44 = vmax.f32 %v1632_v5, %v592_v15 }
  0x87   : > { %v928_v42 = vmin.f32 %v912_v16, %v896_v36  ;;  %v833_v37 = vmax.f32 %v1579_v7, %v785_v9  ;;  %v849_v1 = vmin.f32 %v1581_v31, %v769_v17 }
  0x88   : > { %v736_v4 = vmin.f32 %v598_v44, %v732_v35  ;;  %v738_v46 = vmax.f32 %v598_v44, %v732_v35  ;;  %v818_v49 = vmax.f32 %v754_v54, %v596_v48 }
  0x89   : > { %945 = vst.msk [vmem:[%s1306_s23 + $0x68] sm:$0xff] %vm931_vm1, %v928_v42  ;;  %v865_v32 = vmin.f32 %v833_v37, %v801_v22 }
  0x8a   : > { %v770_v50 = vmin.f32 %v724_v43, %v738_v46  ;;  %v786_v28 = vmin.f32 %v1657_v29, %v736_v4  ;;  %v802_v52 = vmax.f32 %v1657_v29, %v736_v4 }
  0x8b   : > { %v881_v8 = vmin.f32 %v865_v32, %v849_v1  ;;  %v897_v5 = vmax.f32 %v865_v32, %v849_v1 }
  0x8c   : > { %v834_v56 = vmax.f32 %v1602_v61, %v786_v28  ;;  %v850_v7 = vmin.f32 %v1604_v13, %v770_v50 }
  0x8d   : > { %v913_v31 = vmax.f32 %v817_v10, %v881_v8 }
  0x8e   : > { %v866_v57 = vmin.f32 %v834_v56, %v802_v52 }
  0x8f   : > { %v929_v26 = vmin.f32 %v913_v31, %v897_v5 }
  0x90   : > { %v882_v33 = vmin.f32 %v866_v57, %v850_v7  ;;  %v898_v38 = vmax.f32 %v866_v57, %v850_v7 }
  0x91   : > { %946 = vst.msk [vmem:[%s1306_s23 + $0x70] sm:$0xff] %vm931_vm1, %v929_v26 }
  0x92   : > { %v914_v30 = vmax.f32 %v818_v49, %v882_v33 }
  0x94   : > { %v930_v20 = vmin.f32 %v914_v30, %v898_v38 }
  0x96   : > { %947 = vst.msk [vmem:[%s1306_s23 + $0x78] sm:$0xff] %vm931_vm1, %v930_v20 }
  0x97 PF: > { %s12_s11 = sadd.s32 1, %s1128_s11   ;;  %s1712_s9 = smov %s1124_s10 }
  0x98   : > { %p9_p7 = scmp.ge.s32.totalorder %s12_s11, 4   ;;  %s1713_s10 = smov %s1715_s12 }
  0x9a   :  { %11 = sbr.rel (!%p9_p7) target bundleno = 2 (0x2), region = 61 }

</bundles_post_ra>
